<compile_context>
chip_gen: v5e
topology: v5e:2x2
jax: 0.10.0
libtpu: 0.0.40
codegen_flags: <defaults>
</compile_context>

<pallas_src>
import functools

import jax
import jax.numpy as jnp
from jax.experimental import pallas as pl
from jax.experimental.pallas import tpu as pltpu


# ----------------------------------------------------------------------------- utils
def _round_up(x: int, m: int) -> int:
    return (x + m - 1) // m * m


def _largest_mult8_divisor_leq(n: int, cap: int):
    """Largest divisor of n that is a multiple of 8 and <= cap, else None."""
    cap = min(n, cap)
    t = (cap // 8) * 8
    while t >= 8:
        if n % t == 0:
            return t
        t -= 8
    return None


def _tile_s_candidates(s_inner: int, cap: int):
    """Legal set-tile sizes (multiple of 8, or the full extent), descending."""
    if s_inner % 8 != 0 or s_inner <= 8:
        # TODO(synk): ragged set sizes could use a masked last tile instead of a
        # single full-extent block.
        return [s_inner]
    cap = max(8, min(s_inner, cap))
    cands = [t for t in range((cap // 8) * 8, 7, -8) if s_inner % t == 0]
    return cands or [s_inner]


def _tpu_vmem_and_cores():
    """(VMEM bytes per TensorCore, TensorCores per device); conservative fallback."""
    vmem_bytes, num_cores = 64 * 2**20, 1   # assume smallest (v7x) if undetectable
    try:
        info = pltpu.get_tpu_info()
        vmem_bytes = int(getattr(info, "vmem_capacity_bytes", vmem_bytes))
        for attr in ("num_tensorcores", "tensorcore_count", "num_cores",
                     "cores_per_chip"):
            v = getattr(info, attr, None)
            if v:
                num_cores = int(v)
                break
    except Exception:
        pass
    return vmem_bytes, num_cores


def _spec(shape, index_map, buffers=None):
    """BlockSpec with optional explicit buffer count (Buffered(1) for resident weights)."""
    if buffers is not None and buffers != 2 and hasattr(pl, "Buffered"):
        try:
            return pl.BlockSpec(shape, index_map, pipeline_mode=pl.Buffered(buffers))
        except TypeError:
            pass
    return pl.BlockSpec(shape, index_map)


# ----------------------------------------------------------------------------- kernels
def _accumulate_chunk(x_ref, w1_ref, b1_ref, acc_ref, k):
    @pl.when(k == 0)
    def _init():
        acc_ref[...] = jnp.zeros_like(acc_ref)

    # Extractor: collapse (tb, ts, D) -> (tb*ts, D) so the MXU sees one big matmul.
    tb, ts, d = x_ref.shape
    x2d = x_ref[...].reshape(tb * ts, d)                  # operand dtype preserved
    h2d = jnp.dot(x2d, w1_ref[...], preferred_element_type=jnp.float32)
    h2d = jnp.maximum(h2d + b1_ref[...].astype(jnp.float32), 0.0)
    # MBC-consistent partial sum over this set chunk (sublane reduce rides the XLU).
    # TODO(synk): if VALU-bound at tiny D, replace with an MXU segment-sum
    # (block-diagonal ones matrix @ h2d).
    acc_ref[...] += h2d.reshape(tb, ts, -1).sum(axis=1)


def _mbc_fused_kernel(x_ref, w1_ref, b1_ref, w2_ref, b2_ref, o_ref, acc_ref, *,
                      set_size):
    k = pl.program_id(1)            # grid = (batch, set); set is the reduction axis
    _accumulate_chunk(x_ref, w1_ref, b1_ref, acc_ref, k)

    @pl.when(k == pl.num_programs(1) - 1)
    def _finalize():
        pooled = acc_ref[...] * (1.0 / set_size)
        out = jnp.dot(pooled, w2_ref[...].astype(jnp.float32),
                      preferred_element_type=jnp.float32)
        o_ref[...] = (out + b2_ref[...].astype(jnp.float32)).astype(o_ref.dtype)


def _mbc_pooled_kernel(x_ref, w1_ref, b1_ref, o_ref, acc_ref):
    k = pl.program_id(2)            # grid = (batch, set_split, set)
    _accumulate_chunk(x_ref, w1_ref, b1_ref, acc_ref, k)

    @pl.when(k == pl.num_programs(2) - 1)
    def _emit():
        o_ref[...] = acc_ref[...]   # raw f32 partial sum; mean + head done in XLA


# ----------------------------------------------------------------------------- wrapper
def mbc_extract_and_pool(x, w1, b1, w2, b2, *,
                         tile_s=None, tile_b=None, tile_s_cap=4096,
                         set_splits=None, fuse_head=None,
                         compute_dtype=None, x_buffers=2,
                         single_buffer_weights=True):
    """x: (B,S,D); w1: (D,H); b1: (H,)|(1,H); w2: (H,Hout); b2: (Hout,)|(1,Hout).

    Returns (B, Hout) in x.dtype. Equivalent to relu(x @ w1 + b1).mean(1) @ w2 + b2.
    Set compute_dtype=jnp.bfloat16 to halve the X HBM stream (accumulation stays f32).
    """
    out_dtype = x.dtype
    B, S, D = x.shape
    D_w, H = w1.shape
    H_w, Hout = w2.shape
    assert D_w == D and H_w == H

    if compute_dtype is not None:
        x = x.astype(compute_dtype)
        w1 = w1.astype(compute_dtype)

    lane = 128
    Hp = _round_up(H, lane)
    Houtp = _round_up(Hout, lane)

    xsz = jnp.dtype(x.dtype).itemsize
    wsz = jnp.dtype(w1.dtype).itemsize
    w2sz = jnp.dtype(w2.dtype).itemsize
    osz = jnp.dtype(out_dtype).itemsize

    # ---- generation-aware VMEM budget ---------------------------------------------
    vmem_cap, num_cores = _tpu_vmem_and_cores()
    budget = max(32 * 2**20, min(int(0.78 * vmem_cap), vmem_cap - 16 * 2**20))

    # ---- head fusion: keep W2 in the kernel only when it is small ------------------
    if fuse_head is None:
        fuse_head = Hp * Houtp * w2sz <= 4 * 2**20

    # ---- batch tile: give the parallel batch axis >=2 blocks when possible ---------
    if tile_b is None:
        tile_b = B
        if B >= 16:
            want = max(2, num_cores)
            cand = (_largest_mult8_divisor_leq(B, max(8, B // want))
                    or _largest_mult8_divisor_leq(B, B // 2))
            if cand:
                tile_b = cand
    assert B % tile_b == 0 and (tile_b % 8 == 0 or tile_b == B)
    n_b = B // tile_b

    # ---- set split: second parallel axis so a 2-TensorCore chip (v7x) stays busy ---
    if set_splits is None:
        set_splits = 1
        if num_cores >= 2 and n_b < num_cores:
            for p in range(num_cores, 1, -1):
                if S % p == 0 and (S // p) % 8 == 0:
                    set_splits = p
                    break
    assert S % set_splits == 0
    n_par = set_splits
    S_inner = S // n_par
    fuse_head = fuse_head and n_par == 1   # head can't be fused across parallel halves

    # ---- resident-weight buffering (single-buffer when big enough to matter) -------
    w1_bufs = 1 if (single_buffer_weights and D * Hp * wsz > 256 * 1024) else None
    w2_bufs = 1 if (single_buffer_weights and fuse_head
                    and Hp * Houtp * w2sz > 256 * 1024) else None
    w1_cnt = 1 if w1_bufs == 1 else 2
    w2_cnt = 1 if w2_bufs == 1 else 2

    # ---- per-step VMEM estimate (includes the f32 h2d intermediate) ----------------
    def est(tb, ts):
        b = x_buffers * tb * ts * D * xsz              # streamed X tiles
        b += tb * ts * D * xsz                         # flatten copy of the X tile
        b += 2 * tb * ts * Hp * 4                      # f32 h2d + its ReLU'd copy
        b += w1_cnt * (D * Hp + Hp) * wsz              # W1 + b1 (resident)
        if fuse_head:
            b += w2_cnt * (Hp * Houtp + Houtp) * w2sz  # W2 + b2 (resident)
            b += Hp * Houtp * 4                        # f32 cast of W2 in finalize
            b += 2 * tb * Houtp * osz                  # output block (double-buffered)
        else:
            b += 2 * tb * Hp * 4                       # pooled f32 output block
        b += tb * Hp * 4                               # f32 accumulator scratch
        return b

    # ---- set tile: largest multiple-of-8 divisor of S_inner that fits the budget ---
    if tile_s is None:
        while True:
            tile_s = None
            for t in _tile_s_candidates(S_inner, tile_s_cap):
                if est(tile_b, t) <= budget:
                    tile_s = t
                    break
            if tile_s is not None:
                break
            smaller = _largest_mult8_divisor_leq(B, tile_b // 2) if tile_b > 8 else None
            if smaller and smaller < tile_b:
                tile_b, n_b = smaller, B // smaller
                continue
            tile_s = _tile_s_candidates(S_inner, tile_s_cap)[-1]  # smallest legal
            break
    assert S_inner % tile_s == 0 and (tile_s % 8 == 0 or tile_s == S_inner)
    n_s = S_inner // tile_s

    vmem_limit = int(min(max(budget, est(tile_b, tile_s) + 8 * 2**20),
                         max(vmem_cap - 8 * 2**20, 32 * 2**20)))

    # ---- lane-dense padded weights (zero padding is exact; see slicing below) ------
    w1p = jnp.pad(w1, ((0, 0), (0, Hp - H)))
    b1p = jnp.pad(jnp.reshape(b1, (1, H)), ((0, 0), (0, Hp - H)))

    x_bufs = x_buffers if x_buffers != 2 else None

    if fuse_head:
        w2p = jnp.pad(w2, ((0, Hp - H), (0, Houtp - Hout)))
        b2p = jnp.pad(jnp.reshape(b2, (1, Hout)), ((0, 0), (0, Houtp - Hout)))
        out_p = pl.pallas_call(
            functools.partial(_mbc_fused_kernel, set_size=S),
            out_shape=jax.ShapeDtypeStruct((B, Houtp), out_dtype),
            grid_spec=pltpu.PrefetchScalarGridSpec(
                num_scalar_prefetch=0,
                grid=(n_b, n_s),
                in_specs=[
                    _spec((tile_b, tile_s, D), lambda b, k: (b, k, 0), x_bufs),
                    _spec((D, Hp), lambda b, k: (0, 0), w1_bufs),
                    _spec((1, Hp), lambda b, k: (0, 0), None),
                    _spec((Hp, Houtp), lambda b, k: (0, 0), w2_bufs),
                    _spec((1, Houtp), lambda b, k: (0, 0), None),
                ],
                out_specs=pl.BlockSpec((tile_b, Houtp), lambda b, k: (b, 0)),
                scratch_shapes=[pltpu.VMEM((tile_b, Hp), jnp.float32)],
            ),
            compiler_params=pltpu.CompilerParams(
                dimension_semantics=("parallel", "arbitrary"),
                vmem_limit_bytes=vmem_limit,
            ),
        )(x, w1p, b1p, w2p, b2p)
        return out_p[:, :Hout]

    # Unfused head: kernel emits f32 partial sums; mean + Linear(H->Hout) run in XLA
    # (O(B*H*Hout) FLOPs, negligible; frees VMEM for the streamed X tile).
    ns = n_s
    partial_sums = pl.pallas_call(
        _mbc_pooled_kernel,
        out_shape=jax.ShapeDtypeStruct((n_par, B, Hp), jnp.float32),
        grid_spec=pltpu.PrefetchScalarGridSpec(
            num_scalar_prefetch=0,
            grid=(n_b, n_par, n_s),
            in_specs=[
                _spec((tile_b, tile_s, D), lambda b, p, k: (b, p * ns + k, 0), x_bufs),
                _spec((D, Hp), lambda b, p, k: (0, 0), w1_bufs),
                _spec((1, Hp), lambda b, p, k: (0, 0), None),
            ],
            out_specs=pl.BlockSpec((None, tile_b, Hp), lambda b, p, k: (p, b, 0)),
            scratch_shapes=[pltpu.VMEM((tile_b, Hp), jnp.float32)],
        ),
        compiler_params=pltpu.CompilerParams(
            dimension_semantics=("parallel", "parallel", "arbitrary"),
            vmem_limit_bytes=vmem_limit,
        ),
    )(x, w1p, b1p)

    pooled = partial_sums.sum(axis=0)[:, :H] * (1.0 / S)          # (B, H) f32
    out = pooled @ w2.astype(jnp.float32) + jnp.reshape(b2, (1, Hout)).astype(jnp.float32)
    return out.astype(out_dtype)


# ----------------------------------------------------------------------------- reference
def mbc_reference(x, w1, b1, w2, b2):
    h = jnp.maximum(jnp.einsum("bsd,dh->bsh", x, w1) + jnp.reshape(b1, (1, 1, -1)), 0.0)
    pooled = h.mean(axis=1)
    return pooled @ w2 + jnp.reshape(b2, (1, -1))


if __name__ == "__main__":
    B, S, D, H, HOUT = 2, 16, 32, 64, 32

    key = jax.random.PRNGKey(0)
    kx, k1, k2, k3, k4 = jax.random.split(key, 5)
    x = jax.random.normal(kx, (B, S, D), dtype=jnp.float32)
    w1 = jax.random.normal(k1, (D, H), dtype=jnp.float32) * 0.1
    b1 = jax.random.normal(k2, (1, H), dtype=jnp.float32) * 0.1
    w2 = jax.random.normal(k3, (H, HOUT), dtype=jnp.float32) * 0.1
    b2 = jax.random.normal(k4, (1, HOUT), dtype=jnp.float32) * 0.1

    ref = mbc_reference(x, w1, b1, w2, b2)

    # Fused-head path (auto config).
    out = jax.block_until_ready(mbc_extract_and_pool(x, w1, b1, w2, b2))
    assert out.shape == (B, HOUT)
    assert jnp.allclose(out, ref, atol=1e-4, rtol=1e-4), "fused path mismatch"

    # Unfused-head path (pooled partial sums + XLA head).
    out_unfused = jax.block_until_ready(
        mbc_extract_and_pool(x, w1, b1, w2, b2, fuse_head=False))
    assert jnp.allclose(out_unfused, ref, atol=1e-4, rtol=1e-4), "pooled path mismatch"

    # Parallel set-split path (dual-TensorCore layout).
    out_split = jax.block_until_ready(
        mbc_extract_and_pool(x, w1, b1, w2, b2, set_splits=2))
    assert jnp.allclose(out_split, ref, atol=1e-4, rtol=1e-4), "set-split path mismatch"

    print("KERNEL_OK")
</pallas_src>

<mosaic_0001>
module attributes {stable_mosaic.version = 11 : i64} {
  func.func @_mbc_fused_kernel(%arg0: i32, %arg1: i32, %arg2: memref<2x16x32xf32, #tpu.memory_space<vmem>>, %arg3: memref<32x128xf32, #tpu.memory_space<vmem>>, %arg4: memref<1x128xf32, #tpu.memory_space<vmem>>, %arg5: memref<128x128xf32, #tpu.memory_space<vmem>>, %arg6: memref<1x128xf32, #tpu.memory_space<vmem>>, %arg7: memref<2x128xf32, #tpu.memory_space<vmem>>, %arg8: memref<2x128xf32, #tpu.memory_space<vmem>>) attributes {dimension_semantics = [#tpu.dimension_semantics<parallel>, #tpu.dimension_semantics<arbitrary>], iteration_bounds = array<i64: 1, 1>, scalar_prefetch = 0 : i64, scratch_operands = 1 : i64, tpu.core_type = #tpu.core_type<tc>, window_params = [{transform_indices = @transform_0, window_bounds = array<i64: 2, 16, 32>}, {pipeline_mode = #tpu.pipeline_mode<synchronous>, transform_indices = @transform_1, window_bounds = array<i64: 32, 128>}, {pipeline_mode = #tpu.pipeline_mode<synchronous>, transform_indices = @transform_2, window_bounds = array<i64: 1, 128>}, {pipeline_mode = #tpu.pipeline_mode<synchronous>, transform_indices = @transform_3, window_bounds = array<i64: 128, 128>}, {pipeline_mode = #tpu.pipeline_mode<synchronous>, transform_indices = @transform_4, window_bounds = array<i64: 1, 128>}, {transform_indices = @transform_5, window_bounds = array<i64: 2, 128>}]} {
    %c0_i32 = arith.constant 0 : i32
    %0 = arith.cmpi eq, %arg1, %c0_i32 : i32
    %1 = arith.extui %0 : i1 to i32
    %c0_i32_0 = arith.constant 0 : i32
    %2 = arith.cmpi ne, %1, %c0_i32_0 : i32
    scf.if %2 {
      %cst_15 = arith.constant 0.000000e+00 : f32
      %20 = vector.broadcast %cst_15 : f32 to vector<2x128xf32>
      %c0_16 = arith.constant 0 : index
      %c0_17 = arith.constant 0 : index
      %21 = vector.load %arg8[%c0_16, %c0_17] : memref<2x128xf32, #tpu.memory_space<vmem>>, vector<2x128xf32>
      tpu.vector_store %arg8[%c0_16, %c0_17], %20 {strides = array<i32>} : memref<2x128xf32, #tpu.memory_space<vmem>>, vector<2x128xf32>,
    } else {
    }
    %c0 = arith.constant 0 : index
    %c0_1 = arith.constant 0 : index
    %c0_2 = arith.constant 0 : index
    %3 = vector.load %arg2[%c0, %c0_1, %c0_2] : memref<2x16x32xf32, #tpu.memory_space<vmem>>, vector<2x16x32xf32>
    %4 = vector.shape_cast %3 : vector<2x16x32xf32> to vector<32x32xf32>
    %c0_3 = arith.constant 0 : index
    %c0_4 = arith.constant 0 : index
    %5 = vector.load %arg3[%c0_3, %c0_4] : memref<32x128xf32, #tpu.memory_space<vmem>>, vector<32x128xf32>
    %cst = arith.constant dense<0.000000e+00> : vector<32x128xf32>
    %6 = tpu.matmul %4, %5, %cst {dimension_numbers = #tpu.dot_dimension_numbers<[1], [0], [0], [1], [0, 0, 1, 1], [], []>} : vector<32x32xf32>, vector<32x128xf32>, vector<32x128xf32> -> vector<32x128xf32>
    %c0_5 = arith.constant 0 : index
    %c0_6 = arith.constant 0 : index
    %7 = vector.load %arg4[%c0_5, %c0_6] : memref<1x128xf32, #tpu.memory_space<vmem>>, vector<1x128xf32>
    %8 = vector.broadcast %7 : vector<1x128xf32> to vector<32x128xf32>
    %9 = arith.addf %6, %8 : vector<32x128xf32>
    %cst_7 = arith.constant 0.000000e+00 : f32
    %10 = vector.broadcast %cst_7 : f32 to vector<32x128xf32>
    %11 = arith.maximumf %9, %10 : vector<32x128xf32>
    %c0_8 = arith.constant 0 : index
    %c0_9 = arith.constant 0 : index
    %12 = vector.load %arg8[%c0_8, %c0_9] : memref<2x128xf32, #tpu.memory_space<vmem>>, vector<2x128xf32>
    %13 = vector.shape_cast %11 : vector<32x128xf32> to vector<2x16x128xf32>
    %cst_10 = arith.constant dense<0.000000e+00> : vector<2x128xf32>
    %14 = vector.multi_reduction <add>, %13, %cst_10 [1] : vector<2x16x128xf32> to vector<2x128xf32>
    %15 = arith.addf %12, %14 : vector<2x128xf32>
    %c0_11 = arith.constant 0 : index
    %c0_12 = arith.constant 0 : index
    %16 = vector.load %arg8[%c0_11, %c0_12] : memref<2x128xf32, #tpu.memory_space<vmem>>, vector<2x128xf32>
    tpu.vector_store %arg8[%c0_11, %c0_12], %15 {strides = array<i32>} : memref<2x128xf32, #tpu.memory_space<vmem>>, vector<2x128xf32>,
    %c0_i32_13 = arith.constant 0 : i32
    %17 = arith.cmpi eq, %arg1, %c0_i32_13 : i32
    %18 = arith.extui %17 : i1 to i32
    %c0_i32_14 = arith.constant 0 : i32
    %19 = arith.cmpi ne, %18, %c0_i32_14 : i32
    scf.if %19 {
      %c0_15 = arith.constant 0 : index
      %c0_16 = arith.constant 0 : index
      %20 = vector.load %arg8[%c0_15, %c0_16] : memref<2x128xf32, #tpu.memory_space<vmem>>, vector<2x128xf32>
      %cst_17 = arith.constant 6.250000e-02 : f32
      %21 = vector.broadcast %cst_17 : f32 to vector<2x128xf32>
      %22 = arith.mulf %20, %21 : vector<2x128xf32>
      %c0_18 = arith.constant 0 : index
      %c0_19 = arith.constant 0 : index
      %23 = vector.load %arg5[%c0_18, %c0_19] : memref<128x128xf32, #tpu.memory_space<vmem>>, vector<128x128xf32>
      %cst_20 = arith.constant dense<0.000000e+00> : vector<2x128xf32>
      %24 = tpu.matmul %22, %23, %cst_20 {dimension_numbers = #tpu.dot_dimension_numbers<[1], [0], [0], [1], [0, 0, 1, 1], [], []>} : vector<2x128xf32>, vector<128x128xf32>, vector<2x128xf32> -> vector<2x128xf32>
      %c0_21 = arith.constant 0 : index
      %c0_22 = arith.constant 0 : index
      %25 = vector.load %arg6[%c0_21, %c0_22] : memref<1x128xf32, #tpu.memory_space<vmem>>, vector<1x128xf32>
      %26 = vector.broadcast %25 : vector<1x128xf32> to vector<2x128xf32>
      %27 = arith.addf %24, %26 : vector<2x128xf32>
      %c0_23 = arith.constant 0 : index
      %c0_24 = arith.constant 0 : index
      %28 = vector.load %arg7[%c0_23, %c0_24] : memref<2x128xf32, #tpu.memory_space<vmem>>, vector<2x128xf32>
      tpu.vector_store %arg7[%c0_23, %c0_24], %27 {strides = array<i32>} : memref<2x128xf32, #tpu.memory_space<vmem>>, vector<2x128xf32>,
    } else {
    }
    return
  }
  func.func @transform_0(%arg0: i32, %arg1: i32) -> (i32, i32, i32) {
    %c0_i32 = arith.constant 0 : i32
    %c0_i32_0 = arith.constant 0 : i32
    return %arg0, %arg1, %c0_i32 : i32, i32, i32
  }
  func.func @transform_1(%arg0: i32, %arg1: i32) -> (i32, i32) {
    %c0_i32 = arith.constant 0 : i32
    %c0_i32_0 = arith.constant 0 : i32
    %c0_i32_1 = arith.constant 0 : i32
    return %c0_i32, %c0_i32_0 : i32, i32
  }
  func.func @transform_2(%arg0: i32, %arg1: i32) -> (i32, i32) {
    %c0_i32 = arith.constant 0 : i32
    %c0_i32_0 = arith.constant 0 : i32
    %c0_i32_1 = arith.constant 0 : i32
    return %c0_i32, %c0_i32_0 : i32, i32
  }
  func.func @transform_3(%arg0: i32, %arg1: i32) -> (i32, i32) {
    %c0_i32 = arith.constant 0 : i32
    %c0_i32_0 = arith.constant 0 : i32
    %c0_i32_1 = arith.constant 0 : i32
    return %c0_i32, %c0_i32_0 : i32, i32
  }
  func.func @transform_4(%arg0: i32, %arg1: i32) -> (i32, i32) {
    %c0_i32 = arith.constant 0 : i32
    %c0_i32_0 = arith.constant 0 : i32
    %c0_i32_1 = arith.constant 0 : i32
    return %c0_i32, %c0_i32_0 : i32, i32
  }
  func.func @transform_5(%arg0: i32, %arg1: i32) -> (i32, i32) {
    %c0_i32 = arith.constant 0 : i32
    %c0_i32_0 = arith.constant 0 : i32
    return %arg0, %c0_i32 : i32, i32
  }
}

</mosaic_0001>

<bundles_post_ra>
// kernel: tpu_custom_call.1
= control target key start
LH: loop header
LB: loop body
LE: loop exit
PB: predicated region body
PF: predicated region fallthrough
CT: control target
= control target key end

     0   :  { %10 = vsyncpa [#allocation4], 0  ;;  %s391_s0 = inlined_call_operand.hbm [shape: f32[2,16,32], index: 0, kind: input, shape index: {}]   ;;  %s392_s1 = inlined_call_operand.hbm [shape: f32[32,128], index: 1, kind: input, shape index: {}]   ;;  %s393_s2 = inlined_call_operand.vmem [shape: f32[1,128], index: 2, kind: input, shape index: {}]   ;;  %s394_s3 = inlined_call_operand.hbm [shape: f32[128,128], index: 3, kind: input, shape index: {}]   ;;  %s395_s4 = inlined_call_operand.vmem [shape: f32[1,128], index: 4, kind: input, shape index: {}]   ;;  %s396_s5 = inlined_call_operand.hbm [shape: f32[2,128], index: 5, kind: output, shape index: {}]  }
   0x1   :  { %11 = vsyncpa [#allocation7], 0 }
   0x2   :  { %12 = vsyncpa [#allocation5], 0  ;;  %s30_s20 = sshll.u32 %s392_s1, 4  ;;  %s336_s21 = smov [#allocation6]   ;;  %s31_s20 = int_to_ptr.hbm [resolvable:$true] %s30_s20 }
   0x3   :  { %s32_s22 = sshll.u32 %s336_s21, 4  ;;  %s17_s25 = sshll.u32 %s391_s0, 4  ;;  %s33_s22 = int_to_ptr.vmem [resolvable:$true] %s32_s22  ;;  %s18_s25 = int_to_ptr.hbm [resolvable:$true] %s17_s25 }
   0x4   :  { %s337_s26 = smov 128   ;;  %s338_s27 = smov 8  }
   0x5   :  { %38 = dma.hbm_to_vmem [thread:$0]  %s31_s20, 512, %s33_s22, [#allocation7], %s337_s26, %s337_s26, %s338_s27  }
   0x6   :  { %s339_s28 = smov [#allocation3]   ;;  %s45_s7 = sshll.u32 %s394_s3, 4  ;;  %s46_s7 = int_to_ptr.hbm [resolvable:$true] %s45_s7 }
   0x7   :  { %s19_s29 = sshll.u32 %s339_s28, 4  ;;  %s340_s1 = smov [#allocation8]   ;;  %s20_s29 = int_to_ptr.vmem [resolvable:$true] %s19_s29 }
   0x8   :  { %25 = dma.hbm_to_vmem [thread:$0]  %s18_s25, 512, %s20_s29, [#allocation4], %s337_s26, %s337_s26, %s338_s27  }
   0x9   :  { %s47_s8 = sshll.u32 %s340_s1, 4  ;;  %s48_s8 = int_to_ptr.vmem [resolvable:$true] %s47_s8 }
   0xa   :  { %53 = dma.hbm_to_vmem [thread:$0]  %s46_s7, 2048, %s48_s8, [#allocation7], %s337_s26, %s337_s26, %s338_s27  }
   0xb   :  { %330 = dma.done.wait [#allocation4], 512  }
   0xc   :  { %331 = vsyncadd [#allocation4], 4294966784 }
   0xd   :  { %332 = dma.done.wait [#allocation7], 2560  }
   0xe   :  { %333 = vsyncadd [#allocation7], 4294964736  ;;  %v80_v0 = vld [vmem:[#allocation6 + $0x18] sm:$0xff]  ;;  %v79_v1 = vld [vmem:[#allocation6 + $0x10] sm:$0xff]  ;;  %vm85_vm0 = vcmask 261120   ;;  %v341_v14 = vmov 0.0  }
   0xf   :  { %110 = vmatpush.msra.mxu0 %v80_v0  ;;  %221 = vmatpush.msra.mxu2 %v80_v0  ;;  %v78_v2 = vld [vmem:[#allocation6 + $0x8] sm:$0xff]  ;;  %v77_v3 = vld [vmem:[#allocation6] sm:$0xff]  ;;  %v75_v5 = vld [vmem:[#allocation3 + $0x10] sm:$0xff]  ;;  %72 = vst [vmem:[#allocation2] sm:$0x3] %v341_v14  ;;  %vm148_vm1 = vcmask 1041409  }
  0x10   :  { %v73_v4 = vld [vmem:[#allocation3] sm:$0xff]  ;;  %v74_v6 = vld [vmem:[#allocation3 + $0x8] sm:$0xff]  ;;  %v76_v7 = vld [vmem:[#allocation3 + $0x18] sm:$0xff]  ;;  %s342_s10 = smov [#allocation9]   ;;  %s206_s14 = sshll.u32 %s396_s5, 4  ;;  %s207_s14 = int_to_ptr.hbm [resolvable:$true] %s206_s14 }
  0x11   :  { %111 = vmatpush.msra.mxu0 %v79_v1  ;;  %222 = vmatpush.msra.mxu2 %v79_v1  ;;  %v173_v8 = vld [vmem:[#allocation8 + $0x78] sm:$0xff]  ;;  %v172_v9 = vld [vmem:[#allocation8 + $0x70] sm:$0xff]  ;;  %v171_v10 = vld [vmem:[#allocation8 + $0x68] sm:$0xff]  ;;  %s204_s11 = sshll.u32 %s342_s10, 4  ;;  %s205_s11 = int_to_ptr.vmem [resolvable:$true] %s204_s11 }
  0x12   :  { %178 = vmatpush.msra.mxu1 %v173_v8  ;;  %v170_v11 = vld [vmem:[#allocation8 + $0x60] sm:$0xff]  ;;  %v169_v12 = vld [vmem:[#allocation8 + $0x58] sm:$0xff]  ;;  %v168_v13 = vld [vmem:[#allocation8 + $0x50] sm:$0xff] }
  0x13   :  { %112 = vmatpush.msra.mxu0 %v78_v2  ;;  %223 = vmatpush.msra.mxu2 %v78_v2  ;;  %v167_v15 = vld [vmem:[#allocation8 + $0x48] sm:$0xff]  ;;  %v166_v16 = vld [vmem:[#allocation8 + $0x40] sm:$0xff]  ;;  %v165_v17 = vld [vmem:[#allocation8 + $0x38] sm:$0xff] }
  0x14   :  { %179 = vmatpush.msra.mxu1 %v172_v9  ;;  %v164_v19 = vld [vmem:[#allocation8 + $0x30] sm:$0xff]  ;;  %v163_v20 = vld [vmem:[#allocation8 + $0x28] sm:$0xff]  ;;  %v232_v21 = vld [vmem:[%s393_s2] ss:$0 sm:$0xff] }
  0x15   :  { %113 = vmatpush.msra.mxu0 %v77_v3  ;;  %224 = vmatpush.msra.mxu2 %v77_v3  ;;  %v162_v22 = vld [vmem:[#allocation8 + $0x20] sm:$0xff]  ;;  %v161_v23 = vld [vmem:[#allocation8 + $0x18] sm:$0xff]  ;;  %v160_v25 = vld [vmem:[#allocation8 + $0x10] sm:$0xff] }
  0x16   :  { %217 = vmatmul.msk.f32.vlgmr.msra.gmra.mxu0 %vm85_vm0, %v73_v4  ;;  %219 = vmatmul.msk.f32.vlgmr.msra.gmra.mxu2 %vm85_vm0, %v75_v5  ;;  %v159_v28 = vld [vmem:[#allocation8 + $0x8] sm:$0xff]  ;;  %v158_v30 = vld [vmem:[#allocation8] sm:$0xff]  ;;  %v131_v51 = vld [vmem:[#allocation2] sm:$0x3] }
  0x17   :  { %180 = vmatpush.msra.mxu1 %v171_v10  ;;  %v233_v57 = vld [vmem:[%s395_s4] ss:$0 sm:$0xff] }
  0x19   :  { %181 = vmatpush.msra.mxu1 %v170_v11 }
  0x1b   :  { %182 = vmatpush.msra.mxu1 %v169_v12 }
  0x1d   :  { %183 = vmatpush.msra.mxu1 %v168_v13 }
  0x1e   :  { %218 = vmatmul.msk.f32.gmra.mxu0 %vm85_vm0, %v74_v6  ;;  %220 = vmatmul.msk.f32.gmra.mxu2 %vm85_vm0, %v76_v7 }
  0x1f   :  { %184 = vmatpush.msra.mxu1 %v167_v15 }
  0x21   :  { %185 = vmatpush.msra.mxu1 %v166_v16 }
  0x23   :  { %186 = vmatpush.msra.mxu1 %v165_v17 }
  0x25   :  { %187 = vmatpush.msra.mxu1 %v164_v19 }
  0x27   :  { %188 = vmatpush.msra.mxu1 %v163_v20 }
  0x29   :  { %189 = vmatpush.msra.mxu1 %v162_v22 }
  0x2b   :  { %190 = vmatpush.msra.mxu1 %v161_v23 }
  0x2d   :  { %191 = vmatpush.msra.mxu1 %v160_v25 }
  0x2f   :  { %192 = vmatpush.msra.mxu1 %v159_v28 }
  0x31   :  { %193 = vmatpush.msra.mxu1 %v158_v30 }
  0x93   :  { %v115_v18 = vpop.f32.mrf.mxu0 }
  0x94   :  { %v116_v26 = vadd.f32 %v232_v21, %v115_v18 }
  0x96   :  { %v127_v31 = vmax.f32 %v116_v26, 0.0 }
  0x99   :  { %v121_v24 = vpop.f32.mrf.mxu2 }
  0x9a   :  { %v122_v33 = vadd.f32 %v232_v21, %v121_v24 }
  0x9b   :  { %v118_v27 = vpop.f32.mrf.mxu0 }
  0x9c   :  { %v119_v29 = vadd.f32 %v232_v21, %v118_v27  ;;  %v129_v38 = vmax.f32 %v122_v33, 0.0 }
  0x9e   :  { %v128_v32 = vmax.f32 %v119_v29, 0.0 }
  0xa0   :  { %v132_v34 = vadd.f32 %v128_v32, %v127_v31 }
  0xa1   :  { %v124_v35 = vpop.f32.mrf.mxu2 }
  0xa2   :  { %v133_v36 = vrot.slane %v132_v34, 4  ;;  %v125_v37 = vadd.f32 %v232_v21, %v124_v35 }
  0xa4   :  { %v134_v39 = vadd.f32 %v133_v36, %v132_v34  ;;  %v130_v40 = vmax.f32 %v125_v37, 0.0 }
  0xa6   :  { %v135_v41 = vrot.slane %v134_v39, 2  ;;  %v139_v42 = vadd.f32 %v130_v40, %v129_v38 }
  0xa8   :  { %v140_v43 = vrot.slane %v139_v42, 4  ;;  %v136_v44 = vadd.f32 %v135_v41, %v134_v39 }
  0xaa   :  { %v141_v45 = vadd.f32 %v140_v43, %v139_v42  ;;  %v137_v47 = vrot.slane %v136_v44, 1 }
  0xac   :  { %v142_v46 = vrot.slane %v141_v45, 2  ;;  %v138_v50 = vadd.f32 %v137_v47, %v136_v44 }
  0xae   :  { %v143_v48 = vadd.f32 %v142_v46, %v141_v45 }
  0xb0   :  { %v144_v49 = vrot.slane %v143_v48, 1 }
  0xb2   :  { %v145_v52 = vadd.f32 %v144_v49, %v143_v48 }
  0xb4   :  { %v149_v53 = vsel %vm148_vm1, %v145_v52, %v138_v50 }
  0xb5   :  { %v151_v54 = vadd.f32 %v149_v53, %v131_v51 }
  0xb7   :  { %152 = vst [vmem:[#allocation2] sm:$0x3] %v151_v54 }
  0xbe   :  { %v156_v55 = vld [vmem:[#allocation2] sm:$0x3] }
  0xbf   :  { %v157_v56 = vmul.f32 0.0625, %v156_v55 }
  0xc1   :  { %194 = vmatmul.f32.vlgmr.msra.gmra.mxu1 %v157_v56 }
 0x13e   :  { %v195_v58 = vpop.f32.mrf.mxu1 }
 0x13f   :  { %v196_v59 = vadd.f32 %v233_v57, %v195_v58 }
 0x141   :  { %198 = vst [vmem:[#allocation9] sm:$0x3] %v196_v59 }
 0x142   :  { %209 = dma.vmem_to_hbm [thread:$0]  %s205_s11, 32, %s207_s14, [#allocation5]  }
 0x143   :  { %334 = dma.done.wait [#allocation5], 32  }
 0x144   :  { %335 = vsyncadd [#allocation5], 4294967264 }
 0x145   :  { %214 = vsyncpa [#allocation4], 1 }
 0x146   :  { %215 = vsyncpa [#allocation7], 1 }
 0x147   :  { %216 = vsyncpa [#allocation5], 1 }

</bundles_post_ra>
